<compile_context>
chip_gen: v7x
topology: tpu7x:2x2x1
jax: 0.10.0
libtpu: 0.0.40
codegen_flags: <defaults>
</compile_context>

<pallas_src>
import functools
import math

import jax
import jax.numpy as jnp
from jax.experimental import pallas as pl
from jax.experimental.pallas import tpu as pltpu


def _gla_kernel(x_ref, wqkv_ref, bqkv_ref, wg_ref, bg_ref, ws_ref, bs_ref,
                wc_ref, bc_ref, o_ref, state_ref, logc_ref,
                *, n_head, head_dim, chunk, decay):
    H, d, TL = n_head, head_dim, chunk

    # Reset carries at the start of every batch element (first sequence chunk).
    @pl.when(pl.program_id(1) == 0)
    def _():
        state_ref[...] = jnp.zeros_like(state_ref)
        logc_ref[...] = jnp.zeros_like(logc_ref)

    x = x_ref[0].astype(jnp.float32)                      # (TL, D)
    D = x.shape[1]

    # Fused Q/K/V projection: one lane-dense (D, 3D) MXU matmul.
    qkv = jnp.dot(x, wqkv_ref[...], preferred_element_type=jnp.float32) + bqkv_ref[...]
    q = qkv[:, :D]
    k = qkv[:, D:2 * D]
    v = qkv[:, 2 * D:]

    # Per-head gate g = sigmoid(gw(x_head)) via block-diagonal packed weights.
    g = jax.nn.sigmoid(
        jnp.dot(x, wg_ref[...], preferred_element_type=jnp.float32) + bg_ref[...])  # (TL, H)

    # Weighted-cumprod gate:
    #   c = exp(clip(cumsum_L(log(max(g, 1e-6))), -30, 30)) + 1e-6
    # Local cumsum via small in-kernel tril; global offset via (1, H) carry.
    logg = jnp.log(jnp.maximum(g, 1e-6))
    row = jax.lax.broadcasted_iota(jnp.int32, (TL, TL), 0)
    col = jax.lax.broadcasted_iota(jnp.int32, (TL, TL), 1)
    causal = row >= col
    tril = causal.astype(jnp.float32)
    local_cum = jnp.dot(tril, logg, preferred_element_type=jnp.float32)   # (TL, H)
    carry = logc_ref[...]                                                 # (1, H)
    total_logc = carry + local_cum
    c = jnp.exp(jnp.clip(total_logc, -30.0, 30.0)) + 1e-6                 # (TL, H)
    logc_ref[...] = carry + local_cum[TL - 1:TL, :]                       # unclamped carry

    inv_c = pl.reciprocal(c, approx=False)
    if decay:
        r = jax.nn.silu(
            jnp.dot(k, ws_ref[...], preferred_element_type=jnp.float32) + bs_ref[...])
        scale = r * inv_c                                                 # (TL, H) = R_t / c_t
    else:
        scale = inv_c

    outs = []
    for h in range(H):
        lo = h * d
        qh = q[:, lo:lo + d]                                              # (TL, d)
        kh = k[:, lo:lo + d]
        vh = v[:, lo:lo + d]
        sh = scale[:, h:h + 1]                                            # (TL, 1)
        ch = c[:, h:h + 1]                                                # (TL, 1)
        v_scaled = vh * sh                                                # (TL, d)

        s_prev = state_ref[h, :, :]                                       # (d, d) carry

        # Intra-chunk causal term: sum_{t<=l, t in chunk} (R_t/c_t) (q_l.k_t) v_t
        a = jax.lax.dot_general(qh, kh, (((1,), (1,)), ((), ())),
                                preferred_element_type=jnp.float32)       # (TL, TL)
        a = jnp.where(causal, a, 0.0)
        intra = jnp.dot(a, v_scaled, preferred_element_type=jnp.float32)  # (TL, d)
        # Cross-chunk term from the carried state.
        cross = jnp.dot(qh, s_prev, preferred_element_type=jnp.float32)   # (TL, d)
        outs.append(ch * (cross + intra))

        # State update: S += K^T @ (scale * V)
        state_ref[h, :, :] = s_prev + jax.lax.dot_general(
            kh, v_scaled, (((0,), (0,)), ((), ())),
            preferred_element_type=jnp.float32)

    y = jnp.concatenate(outs, axis=1)                                     # (TL, D)
    out = jnp.dot(y, wc_ref[...], preferred_element_type=jnp.float32) + bc_ref[...]
    o_ref[0] = out.astype(o_ref.dtype)


@functools.partial(jax.jit, static_argnames=("n_head", "decay", "chunk"))
def gated_linear_attention(x, wq, bq, wk, bk, wv, bv, wc, bc, w_gw, b_gw,
                           w_sw=None, b_sw=None, *, n_head, decay=True, chunk=None):
    B, L, D = x.shape
    H = n_head
    d = D // H
    TL = chunk if chunk is not None else min(L, 128)
    assert L % TL == 0 and (TL % 8 == 0 or TL == L), "chunk must tile L (mult of 8)"

    f32 = jnp.float32
    # Fuse Q/K/V weights into one (D, 3D) matrix; pack gw/sw (Linear(d,1), shared
    # across heads) into block-diagonal (D, H) matrices so they become one matmul.
    wqkv = jnp.concatenate([wq, wk, wv], axis=1).astype(f32)          # (D, 3D)
    bqkv = jnp.concatenate([bq, bk, bv], axis=1).astype(f32)          # (1, 3D)
    eye_h = jnp.eye(H, dtype=f32)
    wg_blk = jnp.kron(eye_h, jnp.asarray(w_gw, f32).reshape(d, 1))    # (D, H)
    bg_blk = jnp.broadcast_to(jnp.asarray(b_gw, f32).reshape(1, 1), (1, H))
    if decay:
        ws_blk = jnp.kron(eye_h, jnp.asarray(w_sw, f32).reshape(d, 1))
        bs_blk = jnp.broadcast_to(jnp.asarray(b_sw, f32).reshape(1, 1), (1, H))
    else:
        ws_blk = jnp.zeros((D, H), f32)
        bs_blk = jnp.zeros((1, H), f32)

    kernel = functools.partial(_gla_kernel, n_head=H, head_dim=d, chunk=TL, decay=decay)
    const = lambda b, l: (0, 0)

    return pl.pallas_call(
        kernel,
        out_shape=jax.ShapeDtypeStruct((B, L, D), x.dtype),
        grid_spec=pltpu.PrefetchScalarGridSpec(
            num_scalar_prefetch=0,
            grid=(B, L // TL),
            in_specs=[
                pl.BlockSpec((1, TL, D), lambda b, l: (b, l, 0)),   # x chunk
                pl.BlockSpec((D, 3 * D), const),                    # fused W_qkv
                pl.BlockSpec((1, 3 * D), const),                    # fused b_qkv
                pl.BlockSpec((D, H), const),                        # packed gw
                pl.BlockSpec((1, H), const),
                pl.BlockSpec((D, H), const),                        # packed sw
                pl.BlockSpec((1, H), const),
                pl.BlockSpec((D, D), const),                        # c_proj
                pl.BlockSpec((1, D), const),
            ],
            out_specs=pl.BlockSpec((1, TL, D), lambda b, l: (b, l, 0)),
            scratch_shapes=[
                pltpu.VMEM((H, d, d), jnp.float32),   # running per-head K V^T state
                pltpu.VMEM((1, H), jnp.float32),      # running log-cumprod gate carry
            ],
        ),
        compiler_params=pltpu.CompilerParams(
            dimension_semantics=("parallel", "arbitrary")),
    )(x, wqkv, bqkv, wg_blk, bg_blk, ws_blk, bs_blk, wc, bc)


def reference_forward(x, wq, bq, wk, bk, wv, bv, wc, bc, w_gw, b_gw, w_sw, b_sw,
                      *, n_head, decay):
    """Pure-JAX mirror of the PyTorch GatedLinearAttention forward (eval mode)."""
    B, L, D = x.shape
    d = D // n_head
    q = (x @ wq + bq).reshape(B, L, n_head, d)
    k = (x @ wk + bk).reshape(B, L, n_head, d)
    v = (x @ wv + bv).reshape(B, L, n_head, d)
    W = jnp.einsum('blhd,blhe->blhde', k, v)
    g = jax.nn.sigmoid(x.reshape(B, L, n_head, d) @ w_gw + b_gw)      # (B,L,H,1)
    g = jnp.maximum(g, 1e-6)
    logc = jnp.clip(jnp.cumsum(jnp.log(g), axis=1), -30.0, 30.0)
    c = jnp.exp(logc) + 1e-6
    G = c[..., None]                                                  # (B,L,H,1,1)
    if decay:
        R = jax.nn.silu(k @ w_sw + b_sw)[..., None]
    else:
        R = 1.0
    W_out = jnp.cumsum(W * R / G, axis=1) * G
    y = jnp.einsum('blhd,blhde->blhe', q, W_out).reshape(B, L, D)
    return y @ wc + bc


if __name__ == "__main__":
    B, L, D, H = 2, 16, 32, 4     # batch, seq, n_embd, n_head
    d = D // H

    key = jax.random.PRNGKey(0)
    ks = jax.random.split(key, 14)
    x = jax.random.normal(ks[0], (B, L, D), jnp.float32)

    # nn.Linear-like init. Weights stored as (D_in, D_out), i.e. already
    # transposed relative to PyTorch's (out, in) layout.
    s = 1.0 / math.sqrt(D)
    sh = 1.0 / math.sqrt(d)
    u = lambda kk, shape, sc: jax.random.uniform(kk, shape, jnp.float32, -sc, sc)
    wq, wk, wv, wc = u(ks[1], (D, D), s), u(ks[2], (D, D), s), u(ks[3], (D, D), s), u(ks[4], (D, D), s)
    bq, bk, bv, bc = u(ks[5], (1, D), s), u(ks[6], (1, D), s), u(ks[7], (1, D), s), u(ks[8], (1, D), s)
    w_gw, b_gw = u(ks[9], (d, 1), sh), u(ks[10], (1, 1), sh)
    w_sw, b_sw = u(ks[11], (d, 1), sh), u(ks[12], (1, 1), sh)

    # TODO(synk): dropout layers are identity in eval mode and are not modeled.
    for decay in (True, False):
        out = gated_linear_attention(x, wq, bq, wk, bk, wv, bv, wc, bc,
                                     w_gw, b_gw, w_sw, b_sw,
                                     n_head=H, decay=decay, chunk=8)
        out = jax.block_until_ready(out)
        ref = reference_forward(x, wq, bq, wk, bk, wv, bv, wc, bc,
                                w_gw, b_gw, w_sw, b_sw, n_head=H, decay=decay)
        assert out.shape == (B, L, D)
        assert jnp.allclose(out, ref, atol=1e-3, rtol=1e-3), f"mismatch (decay={decay})"

    print("KERNEL_OK")
</pallas_src>

<mosaic_0001>
module attributes {stable_mosaic.version = 11 : i64} {
  func.func @_gla_kernel(%arg0: i32, %arg1: i32, %arg2: memref<1x8x32xf32, #tpu.memory_space<vmem>>, %arg3: memref<32x96xf32, #tpu.memory_space<vmem>>, %arg4: memref<1x96xf32, #tpu.memory_space<vmem>>, %arg5: memref<32x4xf32, #tpu.memory_space<vmem>>, %arg6: memref<1x4xf32, #tpu.memory_space<vmem>>, %arg7: memref<32x4xf32, #tpu.memory_space<vmem>>, %arg8: memref<1x4xf32, #tpu.memory_space<vmem>>, %arg9: memref<32x32xf32, #tpu.memory_space<vmem>>, %arg10: memref<1x32xf32, #tpu.memory_space<vmem>>, %arg11: memref<1x8x32xf32, #tpu.memory_space<vmem>>, %arg12: memref<4x8x8xf32, #tpu.memory_space<vmem>>, %arg13: memref<1x4xf32, #tpu.memory_space<vmem>>) attributes {dimension_semantics = [#tpu.dimension_semantics<parallel>, #tpu.dimension_semantics<arbitrary>], iteration_bounds = array<i64: 2, 2>, scalar_prefetch = 0 : i64, scratch_operands = 2 : i64, tpu.core_type = #tpu.core_type<tc>, window_params = [{transform_indices = @transform_0, window_bounds = array<i64: 1, 8, 32>}, {pipeline_mode = #tpu.pipeline_mode<synchronous>, transform_indices = @transform_1, window_bounds = array<i64: 32, 96>}, {pipeline_mode = #tpu.pipeline_mode<synchronous>, transform_indices = @transform_2, window_bounds = array<i64: 1, 96>}, {pipeline_mode = #tpu.pipeline_mode<synchronous>, transform_indices = @transform_3, window_bounds = array<i64: 32, 4>}, {pipeline_mode = #tpu.pipeline_mode<synchronous>, transform_indices = @transform_4, window_bounds = array<i64: 1, 4>}, {pipeline_mode = #tpu.pipeline_mode<synchronous>, transform_indices = @transform_5, window_bounds = array<i64: 32, 4>}, {pipeline_mode = #tpu.pipeline_mode<synchronous>, transform_indices = @transform_6, window_bounds = array<i64: 1, 4>}, {pipeline_mode = #tpu.pipeline_mode<synchronous>, transform_indices = @transform_7, window_bounds = array<i64: 32, 32>}, {pipeline_mode = #tpu.pipeline_mode<synchronous>, transform_indices = @transform_8, window_bounds = array<i64: 1, 32>}, {transform_indices = @transform_9, window_bounds = array<i64: 1, 8, 32>}]} {
    %c0_i32 = arith.constant 0 : i32
    %0 = arith.cmpi eq, %arg1, %c0_i32 : i32
    %1 = arith.extui %0 : i1 to i32
    %c0_i32_0 = arith.constant 0 : i32
    %2 = arith.cmpi ne, %1, %c0_i32_0 : i32
    scf.if %2 {
      %cst_77 = arith.constant 0.000000e+00 : f32
      %155 = vector.broadcast %cst_77 : f32 to vector<4x8x8xf32>
      %c0_78 = arith.constant 0 : index
      %c0_79 = arith.constant 0 : index
      %c0_80 = arith.constant 0 : index
      %156 = vector.load %arg12[%c0_78, %c0_79, %c0_80] : memref<4x8x8xf32, #tpu.memory_space<vmem>>, vector<4x8x8xf32>
      tpu.vector_store %arg12[%c0_78, %c0_79, %c0_80], %155 {strides = array<i32>} : memref<4x8x8xf32, #tpu.memory_space<vmem>>, vector<4x8x8xf32>,
      %cst_81 = arith.constant 0.000000e+00 : f32
      %157 = vector.broadcast %cst_81 : f32 to vector<1x4xf32>
      %c0_82 = arith.constant 0 : index
      %c0_83 = arith.constant 0 : index
      %158 = vector.load %arg13[%c0_82, %c0_83] : memref<1x4xf32, #tpu.memory_space<vmem>>, vector<1x4xf32>
      tpu.vector_store %arg13[%c0_82, %c0_83], %157 {strides = array<i32>} : memref<1x4xf32, #tpu.memory_space<vmem>>, vector<1x4xf32>,
    } else {
    }
    %c0 = arith.constant 0 : index
    %c0_1 = arith.constant 0 : index
    %c0_2 = arith.constant 0 : index
    %3 = vector.load %arg2[%c0, %c0_1, %c0_2] : memref<1x8x32xf32, #tpu.memory_space<vmem>>, vector<1x8x32xf32>
    %4 = vector.shape_cast %3 : vector<1x8x32xf32> to vector<8x32xf32>
    %c0_3 = arith.constant 0 : index
    %c0_4 = arith.constant 0 : index
    %5 = vector.load %arg3[%c0_3, %c0_4] : memref<32x96xf32, #tpu.memory_space<vmem>>, vector<32x96xf32>
    %cst = arith.constant dense<0.000000e+00> : vector<8x96xf32>
    %6 = tpu.matmul %4, %5, %cst {dimension_numbers = #tpu.dot_dimension_numbers<[1], [0], [0], [1], [0, 0, 1, 1], [], []>} : vector<8x32xf32>, vector<32x96xf32>, vector<8x96xf32> -> vector<8x96xf32>
    %c0_5 = arith.constant 0 : index
    %c0_6 = arith.constant 0 : index
    %7 = vector.load %arg4[%c0_5, %c0_6] : memref<1x96xf32, #tpu.memory_space<vmem>>, vector<1x96xf32>
    %8 = vector.broadcast %7 : vector<1x96xf32> to vector<8x96xf32>
    %9 = arith.addf %6, %8 : vector<8x96xf32>
    %10 = vector.extract_strided_slice %9 {offsets = [0, 0], sizes = [8, 32], strides = [1, 1]} : vector<8x96xf32> to vector<8x32xf32>
    %11 = vector.extract_strided_slice %9 {offsets = [0, 32], sizes = [8, 32], strides = [1, 1]} : vector<8x96xf32> to vector<8x32xf32>
    %12 = vector.extract_strided_slice %9 {offsets = [0, 64], sizes = [8, 32], strides = [1, 1]} : vector<8x96xf32> to vector<8x32xf32>
    %c0_7 = arith.constant 0 : index
    %c0_8 = arith.constant 0 : index
    %13 = vector.load %arg5[%c0_7, %c0_8] : memref<32x4xf32, #tpu.memory_space<vmem>>, vector<32x4xf32>
    %cst_9 = arith.constant dense<0.000000e+00> : vector<8x4xf32>
    %14 = tpu.matmul %4, %13, %cst_9 {dimension_numbers = #tpu.dot_dimension_numbers<[1], [0], [0], [1], [0, 0, 1, 1], [], []>} : vector<8x32xf32>, vector<32x4xf32>, vector<8x4xf32> -> vector<8x4xf32>
    %c0_10 = arith.constant 0 : index
    %c0_11 = arith.constant 0 : index
    %15 = vector.load %arg6[%c0_10, %c0_11] : memref<1x4xf32, #tpu.memory_space<vmem>>, vector<1x4xf32>
    %16 = vector.broadcast %15 : vector<1x4xf32> to vector<8x4xf32>
    %17 = arith.addf %14, %16 : vector<8x4xf32>
    %18 = arith.negf %17 : vector<8x4xf32>
    %19 = math.exp %18 : vector<8x4xf32>
    %cst_12 = arith.constant 1.000000e+00 : f32
    %20 = vector.broadcast %cst_12 : f32 to vector<8x4xf32>
    %21 = arith.addf %20, %19 : vector<8x4xf32>
    %22 = arith.divf %20, %21 : vector<8x4xf32>
    %cst_13 = arith.constant 9.99999997E-7 : f32
    %23 = vector.broadcast %cst_13 : f32 to vector<8x4xf32>
    %24 = arith.maximumf %22, %23 : vector<8x4xf32>
    %25 = math.log %24 : vector<8x4xf32>
    %26 = tpu.iota {dimensions = array<i32: 0>} : vector<8x8xi32>
    %27 = tpu.iota {dimensions = array<i32: 1>} : vector<8x8xi32>
    %28 = arith.cmpi sge, %26, %27 : vector<8x8xi32>
    %29 = arith.extui %28 : vector<8x8xi1> to vector<8x8xi32>
    %30 = arith.sitofp %29 : vector<8x8xi32> to vector<8x8xf32>
    %cst_14 = arith.constant dense<0.000000e+00> : vector<8x4xf32>
    %31 = tpu.matmul %30, %25, %cst_14 {dimension_numbers = #tpu.dot_dimension_numbers<[1], [0], [0], [1], [0, 0, 1, 1], [], []>} : vector<8x8xf32>, vector<8x4xf32>, vector<8x4xf32> -> vector<8x4xf32>
    %c0_15 = arith.constant 0 : index
    %c0_16 = arith.constant 0 : index
    %32 = vector.load %arg13[%c0_15, %c0_16] : memref<1x4xf32, #tpu.memory_space<vmem>>, vector<1x4xf32>
    %33 = vector.broadcast %32 : vector<1x4xf32> to vector<8x4xf32>
    %34 = arith.addf %33, %31 : vector<8x4xf32>
    %cst_17 = arith.constant -3.000000e+01 : f32
    %cst_18 = arith.constant 3.000000e+01 : f32
    %35 = vector.broadcast %cst_17 : f32 to vector<8x4xf32>
    %36 = arith.maximumf %35, %34 : vector<8x4xf32>
    %37 = vector.broadcast %cst_18 : f32 to vector<8x4xf32>
    %38 = arith.minimumf %37, %36 : vector<8x4xf32>
    %39 = math.exp %38 : vector<8x4xf32>
    %cst_19 = arith.constant 9.99999997E-7 : f32
    %40 = vector.broadcast %cst_19 : f32 to vector<8x4xf32>
    %41 = arith.addf %39, %40 : vector<8x4xf32>
    %42 = vector.extract_strided_slice %31 {offsets = [7, 0], sizes = [1, 4], strides = [1, 1]} : vector<8x4xf32> to vector<1x4xf32>
    %43 = arith.addf %32, %42 : vector<1x4xf32>
    %c0_20 = arith.constant 0 : index
    %c0_21 = arith.constant 0 : index
    %44 = vector.load %arg13[%c0_20, %c0_21] : memref<1x4xf32, #tpu.memory_space<vmem>>, vector<1x4xf32>
    tpu.vector_store %arg13[%c0_20, %c0_21], %43 {strides = array<i32>} : memref<1x4xf32, #tpu.memory_space<vmem>>, vector<1x4xf32>,
    %45 = tpu.reciprocal %41 : vector<8x4xf32> -> vector<8x4xf32>
    %c0_22 = arith.constant 0 : index
    %c0_23 = arith.constant 0 : index
    %46 = vector.load %arg7[%c0_22, %c0_23] : memref<32x4xf32, #tpu.memory_space<vmem>>, vector<32x4xf32>
    %cst_24 = arith.constant dense<0.000000e+00> : vector<8x4xf32>
    %47 = tpu.matmul %11, %46, %cst_24 {dimension_numbers = #tpu.dot_dimension_numbers<[1], [0], [0], [1], [0, 0, 1, 1], [], []>} : vector<8x32xf32>, vector<32x4xf32>, vector<8x4xf32> -> vector<8x4xf32>
    %c0_25 = arith.constant 0 : index
    %c0_26 = arith.constant 0 : index
    %48 = vector.load %arg8[%c0_25, %c0_26] : memref<1x4xf32, #tpu.memory_space<vmem>>, vector<1x4xf32>
    %49 = vector.broadcast %48 : vector<1x4xf32> to vector<8x4xf32>
    %50 = arith.addf %47, %49 : vector<8x4xf32>
    %51 = arith.negf %50 : vector<8x4xf32>
    %52 = math.exp %51 : vector<8x4xf32>
    %cst_27 = arith.constant 1.000000e+00 : f32
    %53 = vector.broadcast %cst_27 : f32 to vector<8x4xf32>
    %54 = arith.addf %53, %52 : vector<8x4xf32>
    %55 = arith.divf %53, %54 : vector<8x4xf32>
    %56 = arith.mulf %50, %55 : vector<8x4xf32>
    %57 = arith.mulf %56, %45 : vector<8x4xf32>
    %58 = vector.extract_strided_slice %10 {offsets = [0, 0], sizes = [8, 8], strides = [1, 1]} : vector<8x32xf32> to vector<8x8xf32>
    %59 = vector.extract_strided_slice %11 {offsets = [0, 0], sizes = [8, 8], strides = [1, 1]} : vector<8x32xf32> to vector<8x8xf32>
    %60 = vector.extract_strided_slice %12 {offsets = [0, 0], sizes = [8, 8], strides = [1, 1]} : vector<8x32xf32> to vector<8x8xf32>
    %61 = vector.extract_strided_slice %57 {offsets = [0, 0], sizes = [8, 1], strides = [1, 1]} : vector<8x4xf32> to vector<8x1xf32>
    %62 = vector.extract_strided_slice %41 {offsets = [0, 0], sizes = [8, 1], strides = [1, 1]} : vector<8x4xf32> to vector<8x1xf32>
    %63 = vector.broadcast %61 : vector<8x1xf32> to vector<8x8xf32>
    %64 = arith.mulf %60, %63 : vector<8x8xf32>
    %c0_28 = arith.constant 0 : index
    %c0_29 = arith.constant 0 : index
    %c0_30 = arith.constant 0 : index
    %65 = vector.load %arg12[%c0_28, %c0_29, %c0_30] : memref<4x8x8xf32, #tpu.memory_space<vmem>>, vector<1x8x8xf32>
    %66 = vector.shape_cast %65 : vector<1x8x8xf32> to vector<8x8xf32>
    %cst_31 = arith.constant dense<0.000000e+00> : vector<8x8xf32>
    %67 = tpu.matmul %58, %59, %cst_31 {dimension_numbers = #tpu.dot_dimension_numbers<[1], [1], [0], [0], [0, 0, 1, 0], [], []>} : vector<8x8xf32>, vector<8x8xf32>, vector<8x8xf32> -> vector<8x8xf32>
    %cst_32 = arith.constant 0.000000e+00 : f32
    %68 = vector.broadcast %cst_32 : f32 to vector<8x8xf32>
    %69 = arith.select %28, %67, %68 : vector<8x8xi1>, vector<8x8xf32>
    %cst_33 = arith.constant dense<0.000000e+00> : vector<8x8xf32>
    %70 = tpu.matmul %69, %64, %cst_33 {dimension_numbers = #tpu.dot_dimension_numbers<[1], [0], [0], [1], [0, 0, 1, 1], [], []>} : vector<8x8xf32>, vector<8x8xf32>, vector<8x8xf32> -> vector<8x8xf32>
    %cst_34 = arith.constant dense<0.000000e+00> : vector<8x8xf32>
    %71 = tpu.matmul %58, %66, %cst_34 {dimension_numbers = #tpu.dot_dimension_numbers<[1], [0], [0], [1], [0, 0, 1, 1], [], []>} : vector<8x8xf32>, vector<8x8xf32>, vector<8x8xf32> -> vector<8x8xf32>
    %72 = arith.addf %71, %70 : vector<8x8xf32>
    %73 = vector.broadcast %62 : vector<8x1xf32> to vector<8x8xf32>
    %74 = arith.mulf %73, %72 : vector<8x8xf32>
    %cst_35 = arith.constant dense<0.000000e+00> : vector<8x8xf32>
    %75 = tpu.matmul %59, %64, %cst_35 {dimension_numbers = #tpu.dot_dimension_numbers<[0], [0], [1], [1], [0, 1, 1, 1], [], []>} : vector<8x8xf32>, vector<8x8xf32>, vector<8x8xf32> -> vector<8x8xf32>
    %76 = arith.addf %66, %75 : vector<8x8xf32>
    %c0_36 = arith.constant 0 : index
    %c0_37 = arith.constant 0 : index
    %c0_38 = arith.constant 0 : index
    %77 = vector.load %arg12[%c0_36, %c0_37, %c0_38] : memref<4x8x8xf32, #tpu.memory_space<vmem>>, vector<1x8x8xf32>
    %78 = vector.shape_cast %77 : vector<1x8x8xf32> to vector<8x8xf32>
    %79 = vector.shape_cast %76 : vector<8x8xf32> to vector<1x8x8xf32>
    tpu.vector_store %arg12[%c0_36, %c0_37, %c0_38], %79 {strides = array<i32>} : memref<4x8x8xf32, #tpu.memory_space<vmem>>, vector<1x8x8xf32>,
    %80 = vector.extract_strided_slice %10 {offsets = [0, 8], sizes = [8, 8], strides = [1, 1]} : vector<8x32xf32> to vector<8x8xf32>
    %81 = vector.extract_strided_slice %11 {offsets = [0, 8], sizes = [8, 8], strides = [1, 1]} : vector<8x32xf32> to vector<8x8xf32>
    %82 = vector.extract_strided_slice %12 {offsets = [0, 8], sizes = [8, 8], strides = [1, 1]} : vector<8x32xf32> to vector<8x8xf32>
    %83 = vector.extract_strided_slice %57 {offsets = [0, 1], sizes = [8, 1], strides = [1, 1]} : vector<8x4xf32> to vector<8x1xf32>
    %84 = vector.extract_strided_slice %41 {offsets = [0, 1], sizes = [8, 1], strides = [1, 1]} : vector<8x4xf32> to vector<8x1xf32>
    %85 = vector.broadcast %83 : vector<8x1xf32> to vector<8x8xf32>
    %86 = arith.mulf %82, %85 : vector<8x8xf32>
    %c1 = arith.constant 1 : index
    %c0_39 = arith.constant 0 : index
    %c0_40 = arith.constant 0 : index
    %87 = vector.load %arg12[%c1, %c0_39, %c0_40] : memref<4x8x8xf32, #tpu.memory_space<vmem>>, vector<1x8x8xf32>
    %88 = vector.shape_cast %87 : vector<1x8x8xf32> to vector<8x8xf32>
    %cst_41 = arith.constant dense<0.000000e+00> : vector<8x8xf32>
    %89 = tpu.matmul %80, %81, %cst_41 {dimension_numbers = #tpu.dot_dimension_numbers<[1], [1], [0], [0], [0, 0, 1, 0], [], []>} : vector<8x8xf32>, vector<8x8xf32>, vector<8x8xf32> -> vector<8x8xf32>
    %cst_42 = arith.constant 0.000000e+00 : f32
    %90 = vector.broadcast %cst_42 : f32 to vector<8x8xf32>
    %91 = arith.select %28, %89, %90 : vector<8x8xi1>, vector<8x8xf32>
    %cst_43 = arith.constant dense<0.000000e+00> : vector<8x8xf32>
    %92 = tpu.matmul %91, %86, %cst_43 {dimension_numbers = #tpu.dot_dimension_numbers<[1], [0], [0], [1], [0, 0, 1, 1], [], []>} : vector<8x8xf32>, vector<8x8xf32>, vector<8x8xf32> -> vector<8x8xf32>
    %cst_44 = arith.constant dense<0.000000e+00> : vector<8x8xf32>
    %93 = tpu.matmul %80, %88, %cst_44 {dimension_numbers = #tpu.dot_dimension_numbers<[1], [0], [0], [1], [0, 0, 1, 1], [], []>} : vector<8x8xf32>, vector<8x8xf32>, vector<8x8xf32> -> vector<8x8xf32>
    %94 = arith.addf %93, %92 : vector<8x8xf32>
    %95 = vector.broadcast %84 : vector<8x1xf32> to vector<8x8xf32>
    %96 = arith.mulf %95, %94 : vector<8x8xf32>
    %cst_45 = arith.constant dense<0.000000e+00> : vector<8x8xf32>
    %97 = tpu.matmul %81, %86, %cst_45 {dimension_numbers = #tpu.dot_dimension_numbers<[0], [0], [1], [1], [0, 1, 1, 1], [], []>} : vector<8x8xf32>, vector<8x8xf32>, vector<8x8xf32> -> vector<8x8xf32>
    %98 = arith.addf %88, %97 : vector<8x8xf32>
    %c1_46 = arith.constant 1 : index
    %c0_47 = arith.constant 0 : index
    %c0_48 = arith.constant 0 : index
    %99 = vector.load %arg12[%c1_46, %c0_47, %c0_48] : memref<4x8x8xf32, #tpu.memory_space<vmem>>, vector<1x8x8xf32>
    %100 = vector.shape_cast %99 : vector<1x8x8xf32> to vector<8x8xf32>
    %101 = vector.shape_cast %98 : vector<8x8xf32> to vector<1x8x8xf32>
    tpu.vector_store %arg12[%c1_46, %c0_47, %c0_48], %101 {strides = array<i32>} : memref<4x8x8xf32, #tpu.memory_space<vmem>>, vector<1x8x8xf32>,
    %102 = vector.extract_strided_slice %10 {offsets = [0, 16], sizes = [8, 8], strides = [1, 1]} : vector<8x32xf32> to vector<8x8xf32>
    %103 = vector.extract_strided_slice %11 {offsets = [0, 16], sizes = [8, 8], strides = [1, 1]} : vector<8x32xf32> to vector<8x8xf32>
    %104 = vector.extract_strided_slice %12 {offsets = [0, 16], sizes = [8, 8], strides = [1, 1]} : vector<8x32xf32> to vector<8x8xf32>
    %105 = vector.extract_strided_slice %57 {offsets = [0, 2], sizes = [8, 1], strides = [1, 1]} : vector<8x4xf32> to vector<8x1xf32>
    %106 = vector.extract_strided_slice %41 {offsets = [0, 2], sizes = [8, 1], strides = [1, 1]} : vector<8x4xf32> to vector<8x1xf32>
    %107 = vector.broadcast %105 : vector<8x1xf32> to vector<8x8xf32>
    %108 = arith.mulf %104, %107 : vector<8x8xf32>
    %c2 = arith.constant 2 : index
    %c0_49 = arith.constant 0 : index
    %c0_50 = arith.constant 0 : index
    %109 = vector.load %arg12[%c2, %c0_49, %c0_50] : memref<4x8x8xf32, #tpu.memory_space<vmem>>, vector<1x8x8xf32>
    %110 = vector.shape_cast %109 : vector<1x8x8xf32> to vector<8x8xf32>
    %cst_51 = arith.constant dense<0.000000e+00> : vector<8x8xf32>
    %111 = tpu.matmul %102, %103, %cst_51 {dimension_numbers = #tpu.dot_dimension_numbers<[1], [1], [0], [0], [0, 0, 1, 0], [], []>} : vector<8x8xf32>, vector<8x8xf32>, vector<8x8xf32> -> vector<8x8xf32>
    %cst_52 = arith.constant 0.000000e+00 : f32
    %112 = vector.broadcast %cst_52 : f32 to vector<8x8xf32>
    %113 = arith.select %28, %111, %112 : vector<8x8xi1>, vector<8x8xf32>
    %cst_53 = arith.constant dense<0.000000e+00> : vector<8x8xf32>
    %114 = tpu.matmul %113, %108, %cst_53 {dimension_numbers = #tpu.dot_dimension_numbers<[1], [0], [0], [1], [0, 0, 1, 1], [], []>} : vector<8x8xf32>, vector<8x8xf32>, vector<8x8xf32> -> vector<8x8xf32>
    %cst_54 = arith.constant dense<0.000000e+00> : vector<8x8xf32>
    %115 = tpu.matmul %102, %110, %cst_54 {dimension_numbers = #tpu.dot_dimension_numbers<[1], [0], [0], [1], [0, 0, 1, 1], [], []>} : vector<8x8xf32>, vector<8x8xf32>, vector<8x8xf32> -> vector<8x8xf32>
    %116 = arith.addf %115, %114 : vector<8x8xf32>
    %117 = vector.broadcast %106 : vector<8x1xf32> to vector<8x8xf32>
    %118 = arith.mulf %117, %116 : vector<8x8xf32>
    %cst_55 = arith.constant dense<0.000000e+00> : vector<8x8xf32>
    %119 = tpu.matmul %103, %108, %cst_55 {dimension_numbers = #tpu.dot_dimension_numbers<[0], [0], [1], [1], [0, 1, 1, 1], [], []>} : vector<8x8xf32>, vector<8x8xf32>, vector<8x8xf32> -> vector<8x8xf32>
    %120 = arith.addf %110, %119 : vector<8x8xf32>
    %c2_56 = arith.constant 2 : index
    %c0_57 = arith.constant 0 : index
    %c0_58 = arith.constant 0 : index
    %121 = vector.load %arg12[%c2_56, %c0_57, %c0_58] : memref<4x8x8xf32, #tpu.memory_space<vmem>>, vector<1x8x8xf32>
    %122 = vector.shape_cast %121 : vector<1x8x8xf32> to vector<8x8xf32>
    %123 = vector.shape_cast %120 : vector<8x8xf32> to vector<1x8x8xf32>
    tpu.vector_store %arg12[%c2_56, %c0_57, %c0_58], %123 {strides = array<i32>} : memref<4x8x8xf32, #tpu.memory_space<vmem>>, vector<1x8x8xf32>,
    %124 = vector.extract_strided_slice %10 {offsets = [0, 24], sizes = [8, 8], strides = [1, 1]} : vector<8x32xf32> to vector<8x8xf32>
    %125 = vector.extract_strided_slice %11 {offsets = [0, 24], sizes = [8, 8], strides = [1, 1]} : vector<8x32xf32> to vector<8x8xf32>
    %126 = vector.extract_strided_slice %12 {offsets = [0, 24], sizes = [8, 8], strides = [1, 1]} : vector<8x32xf32> to vector<8x8xf32>
    %127 = vector.extract_strided_slice %57 {offsets = [0, 3], sizes = [8, 1], strides = [1, 1]} : vector<8x4xf32> to vector<8x1xf32>
    %128 = vector.extract_strided_slice %41 {offsets = [0, 3], sizes = [8, 1], strides = [1, 1]} : vector<8x4xf32> to vector<8x1xf32>
    %129 = vector.broadcast %127 : vector<8x1xf32> to vector<8x8xf32>
    %130 = arith.mulf %126, %129 : vector<8x8xf32>
    %c3 = arith.constant 3 : index
    %c0_59 = arith.constant 0 : index
    %c0_60 = arith.constant 0 : index
    %131 = vector.load %arg12[%c3, %c0_59, %c0_60] : memref<4x8x8xf32, #tpu.memory_space<vmem>>, vector<1x8x8xf32>
    %132 = vector.shape_cast %131 : vector<1x8x8xf32> to vector<8x8xf32>
    %cst_61 = arith.constant dense<0.000000e+00> : vector<8x8xf32>
    %133 = tpu.matmul %124, %125, %cst_61 {dimension_numbers = #tpu.dot_dimension_numbers<[1], [1], [0], [0], [0, 0, 1, 0], [], []>} : vector<8x8xf32>, vector<8x8xf32>, vector<8x8xf32> -> vector<8x8xf32>
    %cst_62 = arith.constant 0.000000e+00 : f32
    %134 = vector.broadcast %cst_62 : f32 to vector<8x8xf32>
    %135 = arith.select %28, %133, %134 : vector<8x8xi1>, vector<8x8xf32>
    %cst_63 = arith.constant dense<0.000000e+00> : vector<8x8xf32>
    %136 = tpu.matmul %135, %130, %cst_63 {dimension_numbers = #tpu.dot_dimension_numbers<[1], [0], [0], [1], [0, 0, 1, 1], [], []>} : vector<8x8xf32>, vector<8x8xf32>, vector<8x8xf32> -> vector<8x8xf32>
    %cst_64 = arith.constant dense<0.000000e+00> : vector<8x8xf32>
    %137 = tpu.matmul %124, %132, %cst_64 {dimension_numbers = #tpu.dot_dimension_numbers<[1], [0], [0], [1], [0, 0, 1, 1], [], []>} : vector<8x8xf32>, vector<8x8xf32>, vector<8x8xf32> -> vector<8x8xf32>
    %138 = arith.addf %137, %136 : vector<8x8xf32>
    %139 = vector.broadcast %128 : vector<8x1xf32> to vector<8x8xf32>
    %140 = arith.mulf %139, %138 : vector<8x8xf32>
    %cst_65 = arith.constant dense<0.000000e+00> : vector<8x8xf32>
    %141 = tpu.matmul %125, %130, %cst_65 {dimension_numbers = #tpu.dot_dimension_numbers<[0], [0], [1], [1], [0, 1, 1, 1], [], []>} : vector<8x8xf32>, vector<8x8xf32>, vector<8x8xf32> -> vector<8x8xf32>
    %142 = arith.addf %132, %141 : vector<8x8xf32>
    %c3_66 = arith.constant 3 : index
    %c0_67 = arith.constant 0 : index
    %c0_68 = arith.constant 0 : index
    %143 = vector.load %arg12[%c3_66, %c0_67, %c0_68] : memref<4x8x8xf32, #tpu.memory_space<vmem>>, vector<1x8x8xf32>
    %144 = vector.shape_cast %143 : vector<1x8x8xf32> to vector<8x8xf32>
    %145 = vector.shape_cast %142 : vector<8x8xf32> to vector<1x8x8xf32>
    tpu.vector_store %arg12[%c3_66, %c0_67, %c0_68], %145 {strides = array<i32>} : memref<4x8x8xf32, #tpu.memory_space<vmem>>, vector<1x8x8xf32>,
    %146 = tpu.concatenate %74, %96, %118, %140 in 1 : vector<8x8xf32>, vector<8x8xf32>, vector<8x8xf32>, vector<8x8xf32> -> vector<8x32xf32>
    %c0_69 = arith.constant 0 : index
    %c0_70 = arith.constant 0 : index
    %147 = vector.load %arg9[%c0_69, %c0_70] : memref<32x32xf32, #tpu.memory_space<vmem>>, vector<32x32xf32>
    %cst_71 = arith.constant dense<0.000000e+00> : vector<8x32xf32>
    %148 = tpu.matmul %146, %147, %cst_71 {dimension_numbers = #tpu.dot_dimension_numbers<[1], [0], [0], [1], [0, 0, 1, 1], [], []>} : vector<8x32xf32>, vector<32x32xf32>, vector<8x32xf32> -> vector<8x32xf32>
    %c0_72 = arith.constant 0 : index
    %c0_73 = arith.constant 0 : index
    %149 = vector.load %arg10[%c0_72, %c0_73] : memref<1x32xf32, #tpu.memory_space<vmem>>, vector<1x32xf32>
    %150 = vector.broadcast %149 : vector<1x32xf32> to vector<8x32xf32>
    %151 = arith.addf %148, %150 : vector<8x32xf32>
    %c0_74 = arith.constant 0 : index
    %c0_75 = arith.constant 0 : index
    %c0_76 = arith.constant 0 : index
    %152 = vector.load %arg11[%c0_74, %c0_75, %c0_76] : memref<1x8x32xf32, #tpu.memory_space<vmem>>, vector<1x8x32xf32>
    %153 = vector.shape_cast %152 : vector<1x8x32xf32> to vector<8x32xf32>
    %154 = vector.shape_cast %151 : vector<8x32xf32> to vector<1x8x32xf32>
    tpu.vector_store %arg11[%c0_74, %c0_75, %c0_76], %154 {strides = array<i32>} : memref<1x8x32xf32, #tpu.memory_space<vmem>>, vector<1x8x32xf32>,
    return
  }
  func.func @transform_0(%arg0: i32, %arg1: i32) -> (i32, i32, i32) {
    %c0_i32 = arith.constant 0 : i32
    %c0_i32_0 = arith.constant 0 : i32
    return %arg0, %arg1, %c0_i32 : i32, i32, i32
  }
  func.func @transform_1(%arg0: i32, %arg1: i32) -> (i32, i32) {
    %c0_i32 = arith.constant 0 : i32
    %c0_i32_0 = arith.constant 0 : i32
    %c0_i32_1 = arith.constant 0 : i32
    return %c0_i32, %c0_i32_0 : i32, i32
  }
  func.func @transform_2(%arg0: i32, %arg1: i32) -> (i32, i32) {
    %c0_i32 = arith.constant 0 : i32
    %c0_i32_0 = arith.constant 0 : i32
    %c0_i32_1 = arith.constant 0 : i32
    return %c0_i32, %c0_i32_0 : i32, i32
  }
  func.func @transform_3(%arg0: i32, %arg1: i32) -> (i32, i32) {
    %c0_i32 = arith.constant 0 : i32
    %c0_i32_0 = arith.constant 0 : i32
    %c0_i32_1 = arith.constant 0 : i32
    return %c0_i32, %c0_i32_0 : i32, i32
  }
  func.func @transform_4(%arg0: i32, %arg1: i32) -> (i32, i32) {
    %c0_i32 = arith.constant 0 : i32
    %c0_i32_0 = arith.constant 0 : i32
    %c0_i32_1 = arith.constant 0 : i32
    return %c0_i32, %c0_i32_0 : i32, i32
  }
  func.func @transform_5(%arg0: i32, %arg1: i32) -> (i32, i32) {
    %c0_i32 = arith.constant 0 : i32
    %c0_i32_0 = arith.constant 0 : i32
    %c0_i32_1 = arith.constant 0 : i32
    return %c0_i32, %c0_i32_0 : i32, i32
  }
  func.func @transform_6(%arg0: i32, %arg1: i32) -> (i32, i32) {
    %c0_i32 = arith.constant 0 : i32
    %c0_i32_0 = arith.constant 0 : i32
    %c0_i32_1 = arith.constant 0 : i32
    return %c0_i32, %c0_i32_0 : i32, i32
  }
  func.func @transform_7(%arg0: i32, %arg1: i32) -> (i32, i32) {
    %c0_i32 = arith.constant 0 : i32
    %c0_i32_0 = arith.constant 0 : i32
    %c0_i32_1 = arith.constant 0 : i32
    return %c0_i32, %c0_i32_0 : i32, i32
  }
  func.func @transform_8(%arg0: i32, %arg1: i32) -> (i32, i32) {
    %c0_i32 = arith.constant 0 : i32
    %c0_i32_0 = arith.constant 0 : i32
    %c0_i32_1 = arith.constant 0 : i32
    return %c0_i32, %c0_i32_0 : i32, i32
  }
  func.func @transform_9(%arg0: i32, %arg1: i32) -> (i32, i32, i32) {
    %c0_i32 = arith.constant 0 : i32
    %c0_i32_0 = arith.constant 0 : i32
    return %arg0, %arg1, %c0_i32 : i32, i32, i32
  }
}

</mosaic_0001>

<bundles_post_ra>
// kernel: gated_linear_attention.1
= control target key start
LH: loop header
LB: loop body
LE: loop exit
PB: predicated region body
PF: predicated region fallthrough
CT: control target
= control target key end

     0   :  { %14 = vsyncpa [#allocation5], 0  ;;  %s3256_s0 = inlined_call_operand.vmem [shape: f32[2,16,32], index: 0, kind: input, shape index: {}]   ;;  %s3257_s1 = inlined_call_operand.vmem [shape: f32[32,96], index: 1, kind: input, shape index: {}]   ;;  %s3258_s2 = inlined_call_operand.vmem [shape: f32[1,96], index: 2, kind: input, shape index: {}]   ;;  %s3259_s3 = inlined_call_operand.vmem [shape: f32[32,4], index: 3, kind: input, shape index: {}]   ;;  %s3260_s4 = inlined_call_operand.vmem [shape: f32[1,4], index: 4, kind: input, shape index: {}]   ;;  %s3261_s5 = inlined_call_operand.vmem [shape: f32[32,4], index: 5, kind: input, shape index: {}]   ;;  %s3262_s6 = inlined_call_operand.vmem [shape: f32[1,4], index: 6, kind: input, shape index: {}]   ;;  %s3263_s7 = inlined_call_operand.vmem [shape: f32[32,32], index: 7, kind: input, shape index: {}]   ;;  %s3264_s8 = inlined_call_operand.vmem [shape: f32[1,32], index: 8, kind: input, shape index: {}]   ;;  %s3265_s9 = inlined_call_operand.hbm [shape: f32[2,16,32], index: 9, kind: output, shape index: {}]  }
   0x1   :  { %16 = vsyncpa [#allocation5 + $0x1], 0  ;;  %s2878_s30 = smov 0   ;;  %s2880_s10 = smov 0  }
   0x2   :  { %s2882_s11 = smov 0   ;;  %s2884_s12 = smov 0  }
   0x3   :  { %s2886_s13 = smov 0   ;;  %s2888_s14 = smov 0  }
   0x4   :  { %s2890_s15 = smov 0   ;;  %s2892_s16 = smov 0  }
   0x5 LB: > { %3270 = sst [smem:[#allocation7_spill]] %s2798_s15  ;;  %s2331_s17 = sadd.s32 4294967295, %s2802_s16   ;;  %s2802_s16 = sphi %s2892_s16, %s22_s16   ;;  %s2798_s15 = sphi %s2890_s15, %s3280_s15   ;;  %s2794_s14 = sphi %s2888_s14, %s3285_s14   ;;  %s2790_s13 = sphi %s2886_s13, %s3278_s13   ;;  %s2786_s12 = sphi %s2884_s12, %s3284_s12   ;;  %s2782_s11 = sphi %s2882_s11, %s3283_s11   ;;  %s2778_s10 = sphi %s2880_s10, %s3282_s10   ;;  %s2774_s30 = sphi %s2878_s30, %s3281_s30  }
   0x6   : > { %s2332_s18 = sadd.s32 4294967294, %s2802_s16   ;;  %s31_s19 = sadd.s32 1, %s2794_s14 }
   0x7   : > { %p32_p0 = scmp.ge.s32.totalorder %s31_s19, 2  ;;  %s34_s20 = sadd.s32 1, %s2798_s15 }
   0x8   : > { %p249_p1 = scmp.ne.s32.totalorder %s2782_s11, %s2778_s10  ;;  %p250_p2 = scmp.eq.s32.totalorder %s2331_s17, 3 }
   0x9   : > { %s3287_s19 = smov (%p32_p0, %s31_s19), 0  ;;  %s3289_s20 = smov (!%p32_p0, %s34_s20), %s2798_s15 }
   0xa   : > { %3271 = sst [smem:[#allocation8_spill]] %s3287_s19  ;;  %s235_s21 = ssub.s32 %s2794_s14, %s3287_s19 }
   0xb   : > { %p2929_p3 = por %p250_p2, %p249_p1  ;;  %p36_p4 = scmp.ge.s32.totalorder %s3289_s20, 2 }
   0xc   : > { %p255_p5 = scmp.ne.s32.totalorder %s2778_s10, %s2774_s30  ;;  %p256_p6 = scmp.eq.s32.totalorder %s2332_s18, 3 }
   0xd   : > { %p2335_p7 = scmp.ge.s32.totalorder %s2802_s16, 1  ;;  %s3291_s20 = smov (%p36_p4, %s3289_s20), 0 }
   0xe   : > { %3273 = sst [smem:[#allocation9_spill]] %s3291_s20  ;;  %p2938_p8 = por %p256_p6, %p255_p5 }
   0xf   : > { %p309_p9 = scmp.lt.s32.totalorder %s2802_s16, 5  ;;  %s234_s24 = ssub.s32 %s2798_s15, %s3291_s20 }
  0x10   : > { %s239_s25 = sadd.s32 1, %s2782_s11  ;;  %s236_s26 = sor.u32 %s235_s21, %s234_s24 }
  0x11   : > { %p310_p10 = pnand %p2335_p7, %p309_p9  ;;  %p237_p11 = scmp.eq.s32.totalorder %s236_s26, 0 }
  0x12   : > { %s3269_s28 = sand.u32 (!%p310_p10), 1, %s2778_s10   ;;  %p348_p12 = scmp.lt.s32.totalorder (!%p310_p10), %s2790_s13, 1 }
  0x13   : > { %s2947_s27 = scalar_select %p237_p11, %s2782_s11, %s239_s25  }
  0x14   : > { %313 = sbr.rel (%p310_p10) target bundleno = 1761 (0x6e1), region = 56  ;;  %s2953_s29 = sshll.u32 (!%p310_p10), %s3269_s28, 3 }
  0x15   : > { %p350_p13 = scmp.lt.s32.totalorder (!%p310_p10), %s2786_s12, 1  ;;  %s347_s15 = scalar_lea.vmem (!%p310_p10), [#allocation4], %s2953_s29 }
  0x16   : > { %p2339_p0 = scmp.ne.s32.totalorder (!%p310_p10), %s2786_s12, 0 }
  0x1b   : > { %s349_s17 = scalar_select %p348_p12, %s2790_s13, 1 }
  0x1c   : > { %s351_s18 = scalar_select %p350_p13, %s2786_s12, 1 }
  0x1d   : > { %s2337_s21 = sshll.u32 %s349_s17, 1  ;;  %359 = sbr.rel (%p2339_p0) target bundleno = 36 (0x24), region = 60  ;;  %vm360_vm0 = vcmask (!%p2339_p0), 64512   ;;  %vm365_vm1 = vcmask (!%p2339_p0), 24576   ;;  %v2804_v0 = vmov (!%p2339_p0), 0.0  }
  0x1e   : > { %s353_s24 = sadd.s32 %s2337_s21, %s351_s18  ;;  %361 = vst.msk [vmem:[#allocation2] sm:$0xff] (!%p2339_p0), %vm360_vm0, %v2804_v0  ;;  %362 = vst.msk [vmem:[#allocation2 + $0x8] sm:$0xff] (!%p2339_p0), %vm360_vm0, %v2804_v0 }
  0x1f   : > { %s2338_s25 = sshll.u32 %s353_s24, 3  ;;  %363 = vst.msk [vmem:[#allocation2 + $0x10] sm:$0xff] (!%p2339_p0), %vm360_vm0, %v2804_v0  ;;  %364 = vst.msk [vmem:[#allocation2 + $0x18] sm:$0xff] (!%p2339_p0), %vm360_vm0, %v2804_v0 }
  0x20   : > { %s2961_s19 = scalar_lea.vmem %s3256_s0, %s2338_s25  ;;  %366 = vst.msk [vmem:[#allocation3] sm:$0x1] (!%p2339_p0), %vm365_vm1, %v2804_v0 }
  0x24 PF: > { %v368_v1 = vld [vmem:[%s3257_s1] sm:$0xff]  ;;  %v369_v2 = vld [vmem:[%s3257_s1 + $0x8] sm:$0xff]  ;;  %v370_v3 = vld [vmem:[%s3257_s1 + $0x10] sm:$0xff]  ;;  %v2805_v4 = vmov 0.0|0.0   ;;  %vm2806_vm2 = vmmov 0   ;;  %v2807_v7 = vmov 0.0   ;;  %v543_v35 = vlaneseq }
  0x25   : > { %2561 = vmatprep.subr.bf16.mxu0 %v2805_v4  ;;  %v2562_v5 = vpack.c.bf16 %v369_v2, %v368_v1  ;;  %v371_v6 = vld [vmem:[%s3257_s1 + $0x18] sm:$0xff]  ;;  %2440 = vmatprep.mubr.msk.f32.mxu0 %vm2806_vm2, %v2807_v7  ;;  %v453_v8 = vld [vmem:[%s3259_s3] sm:$0xff]  ;;  %v454_v9 = vld [vmem:[%s3259_s3 + $0x8] sm:$0xff]  ;;  %vm379_vm3 = vcmask 261120   ;;  %s2808_s20 = smov 96   ;;  %vm550_vm5 = vcmask 64512  }
  0x26   : > { %2567 = vmatprep.subr.bf16.mxu1 %v2805_v4  ;;  %v455_v10 = vld [vmem:[%s3259_s3 + $0x10] sm:$0xff]  ;;  %v456_v11 = vld [vmem:[%s3259_s3 + $0x18] sm:$0xff]  ;;  %2451 = vmatprep.mubr.msk.f32.mxu1 %vm2806_vm2, %v2807_v7  ;;  %v2565_v12 = vpack.c.bf16 %v371_v6, %v370_v3  ;;  %v2568_v13 = vpack.c.bf16 %v454_v9, %v453_v8  ;;  %v367_v15 = vld [vmem:[%s2961_s19] sm:$0xff]  ;;  %v544_v36 = vshrl.u32 %v543_v35, 7  ;;  %v546_v37 = vand.u32 127, %v543_v35  ;;  %s2813_s25 = smov 80  }
  0x27   : > { %2563 = vmatpush3.bf16.msra.mxu0 %v2562_v5  ;;  %v2571_v14 = vpack.c.bf16 %v456_v11, %v455_v10  ;;  %v660_v16 = vld [vmem:[%s3261_s5] sm:$0xff]  ;;  %v661_v17 = vld [vmem:[%s3261_s5 + $0x8] sm:$0xff]  ;;  %v662_v18 = vld [vmem:[%s3261_s5 + $0x10] sm:$0xff]  ;;  %v2809_v43 = vmov 1   ;;  %v2810_v44 = vmov 0   ;;  %vm657_vm6 = vcmask 24576  }
  0x28   : > { %2564 = vmatprep.subr.bf16.mxu0 %v2805_v4  ;;  %2569 = vmatpush3.bf16.msra.mxu1 %v2568_v13  ;;  %v2574_v19 = vpack.c.bf16 %v661_v17, %v660_v16  ;;  %v663_v20 = vld [vmem:[%s3261_s5 + $0x18] sm:$0xff]  ;;  %v2340_v22 = vld [vmem:[%s3258_s2] ss:$0 sm:$0xff]  ;;  %vm3029_vm4 = vcmp.ge.s32.totalorder %v544_v36, %v546_v37  ;;  %v2811_v45 = vmov 1966171168   ;;  %v628_v58 = vsub.s32 0, %v544_v36 }
  0x29   : > { %2570 = vmatprep.subr.bf16.mxu1 %v2805_v4  ;;  %v2577_v21 = vpack.c.bf16 %v663_v20, %v662_v18  ;;  %v2342_v24 = vld [vmem:[%s3260_s4] ss:$0 sm:$0xff]  ;;  %v2345_v41 = vsel %vm3029_vm4, 1.0, %v2807_v7  ;;  %2688 = vset.pattern.permute.xlu1 %v2809_v43  ;;  %v640_v46 = vunpack.c.l.s4 %v2811_v45  ;;  %v2812_v16 = vmov 2   ;;  %s2814_s28 = smov 120   ;;  %s2815_s26 = smov 88  }
  0x2a   : > { %2687 = vset.pattern.permute.xlu0 %v2810_v44  ;;  %v624_v56 = vld [vmem:[#allocation3] sm:$0x1]  ;;  %s2816_s17 = smov 112   ;;  %s2817_s18 = smov 72   ;;  %vm2148_vm7 = vcmask 130048   ;;  %vm2150_vm8 = vcmask 195584  }
  0x2b   : > { %2566 = vmatpush3.bf16.msra.mxu0 %v2565_v12  ;;  %v641_v47 = vunpack.c.0.s8 %v640_v46  ;;  %v629_v59 = vrot.slane %v624_v56, %v628_v58  ;;  %v2348_v63 = vld [vmem:[%s3262_s6] ss:$0 sm:$0xff]  ;;  %s2818_s19 = smov 104   ;;  %s2820_s21 = smov 56  }
  0x2c   : > { %2454 = vmatprep.subr.mxu0 %v2807_v7  ;;  %2572 = vmatpush3.bf16.msra.mxu1 %v2571_v14  ;;  %s2821_s24 = smov 48  }
  0x2d   : > { %2573 = vmatprep.subr.bf16.mxu1 %v2805_v4  ;;  %v644_v48 = vsub.s32 %v641_v47, %v544_v36 }
  0x2e   : > { %2441 = vmatmul.mubr.msk.f32.vlgmr.msra.gmra.mrb[0].mxu0 %vm379_vm3, %v367_v15 }
  0x2f   : > { %2456 = vmatprep.mubr.msk.f32.mxu0 %vm2806_vm2, %v2807_v7  ;;  %2452 = vmatmul.mubr.msk.f32.vlgmr.msra.gmra.mrb[0].mxu1 %vm379_vm3, %v367_v15 }
  0x30   : > { %2467 = vmatprep.mubr.msk.f32.mxu1 %vm2806_vm2, %v2807_v7  ;;  %2575 = vmatpush3.bf16.msra.mxu1 %v2574_v19 }
  0x31   : > { %2576 = vmatprep.subr.bf16.mxu1 %v2805_v4 }
  0x34   : > { %2578 = vmatpush3.bf16.msra.mxu1 %v2577_v21 }
  0x35   : > { %2485 = vmatprep.subr.mxu1 %v2807_v7 }
 0x101   : > { %v449_v23 = vpop.f32.mrb[0].mxu0 }
 0x102   : > { %v3026_v25 = vadd.f32 %v2340_v22, %v449_v23  ;;  %v2442_v26 = vpop.f32.mrb[1].mxu0  ;;  %v530_v27 = vpop.f32.mrb[0].mxu1 }
 0x103   : > { %v531_v28 = vadd.f32 %v2342_v24, %v530_v27  ;;  %v2453_v29 = vpop.f32.mrb[1].mxu1  ;;  %v2822_v24 = vmov 3  }
 0x104   : > { %672 = vrot.lane.b32.xlu0 %v3026_v25, %s2808_s20  ;;  %s2819_s20 = smov 64  }
 0x105   : > { %v2344_v30 = vmul.f32 -1.442695, %v531_v28 }
 0x107   : > { %2694 = vpow2.f32 %v2344_v30 }
 0x111   : > { %v2695_v31 = vpop.eup %2694 }
 0x112   : > { %v537_v32 = vadd.f32 1.0, %v2695_v31 }
 0x114   : > { %2696 = vrcp.f32 %v537_v32 }
 0x11e   : > { %v2697_v33 = vpop.eup %2696 }
 0x11f   : > { %v540_v34 = vmax.f32 %v2697_v33, 1e-06 }
 0x121   : > { %2698 = vlog2.f32 %v540_v34  ;;  %v760_v34 = vld [vmem:[#allocation2] sm:$0xff] }
 0x12b   : > { %v2699_v39 = vpop.eup %2698 }
 0x12c   : > { %v542_v40 = vmul.f32 0.6931472, %v2699_v39 }
 0x12e   : > { %2455 = vmatpush3.msra.mxu0 %v542_v40 }
 0x12f   : > { %2457 = vmatmul.mubr.msk.f32.vlgmr.msra.gmra.mrb[2].mxu0 %vm550_vm5, %v2345_v41  ;;  %2470 = vmatprep.subr.mxu0 %v2807_v7 }
 0x130   : > { %2472 = vmatprep.mubr.msk.f32.mxu0 %vm2806_vm2, %v2807_v7 }
 0x176   : > { %v3040_v42 = vpop.permute.xlu0 %672 }
 0x177   : > { %2468 = vmatmul.mubr.msk.f32.vlgmr.msra.gmra.mrb[2].mxu1 %vm379_vm3, %v3040_v42  ;;  %2471 = vmatpush3.xpose.msk.msra.mxu0 %vm550_vm5, %v3040_v42 }
 0x178   : > { %2475 = vmatprep.subr.mxu0 %v2807_v7  ;;  %2487 = vmatprep.mubr.msk.f32.mxu1 %vm2806_vm2, %v2807_v7 }
 0x17a   : > { %2473 = vmatmul.mubr.msk.f32.vlgmr.msra.gmra.mrb[4].mxu0 %vm550_vm5, %v3026_v25 }
 0x17b   : > { %2477 = vmatprep.mubr.msk.f32.mxu0 %vm2806_vm2, %v2807_v7 }
 0x202   : > { %v620_v49 = vpop.f32.mrb[2].mxu0 }
 0x203   : > { %v638_v50 = vcombine.high %v620_v49, %v620_v49  ;;  %v2458_v51 = vpop.f32.mrb[3].mxu0  ;;  %v631_v60 = vadd.f32 %v629_v59, %v620_v49 }
 0x205   : > { %v645_v52 = vrot.slane %v638_v50, %v644_v48  ;;  %v2347_v61 = vclamps-f32 %v631_v60, 30.0 }
 0x207   : > { %v646_v53 = vcombine.high %v645_v52, %v645_v52  ;;  %v634_v62 = vmul.f32 1.442695, %v2347_v61 }
 0x209   : > { %v653_v54 = vrot.slane %v646_v53, %v644_v48  ;;  %2700 = vpow2.f32 %v634_v62  ;;  %v1103_v48 = vld [vmem:[#allocation2 + $0x8] sm:$0xff] }
 0x20b   : > { %v654_v55 = vcombine.high %v653_v54, %v653_v54 }
 0x20d   : > { %v656_v57 = vadd.f32 %v654_v55, %v624_v56  ;;  %v1449_v55 = vld [vmem:[#allocation2 + $0x10] sm:$0xff] }
 0x20f   : > { %658 = vst.msk [vmem:[#allocation3] sm:$0x1] %vm657_vm6, %v656_v57 }
 0x213   : > { %v2701_v8 = vpop.eup %2700 }
 0x214   : > { %v3060_v9 = vadd.f32 1e-06, %v2701_v8 }
 0x24a   : > { %v742_v0 = vpop.f32.mrb[2].mxu1 }
 0x24b   : > { %v743_v1 = vadd.f32 %v2348_v63, %v742_v0  ;;  %v2469_v2 = vpop.f32.mrb[3].mxu1  ;;  %v1795_v63 = vld [vmem:[#allocation2 + $0x18] sm:$0xff] }
 0x24d   : > { %v2350_v3 = vmul.f32 -1.442695, %v743_v1  ;;  %v3058_v5 = vpop.f32.mrb[4].mxu0 }
 0x24e   : > { %v2474_v6 = vpop.f32.mrb[5].mxu0  ;;  %v835_v33 = vsel %vm3029_vm4, %v3058_v5, 0.0 }
 0x24f   : > { %2702 = vpow2.f32 %v2350_v3 }
 0x250   : > { %2704 = vrcp.f32 %v3060_v9 }
 0x259   : > { %v2703_v10 = vpop.eup %2702 }
 0x25a   : > { %v749_v11 = vadd.f32 1.0, %v2703_v10  ;;  %v2705_v12 = vpop.eup %2704 }
 0x25c   : > { %2706 = vrcp.f32 %v749_v11 }
 0x266   : > { %v2707_v13 = vpop.eup %2706 }
 0x267   : > { %v752_v14 = vmul.f32 %v2707_v13, %v743_v1 }
 0x269   : > { %v753_v15 = vmul.f32 %v2705_v12, %v752_v14  ;;  %v2152_v14 = vld [vmem:[%s3263_s7] sm:$0xff] }
 0x26b   : > { %1098 = vperm.xlu1 %2688, %v753_v15   ;;  %756 = vperm.xlu0 %2687, %v753_v15  }
 0x26f   : > { %2689 = vset.pattern.permute.xlu1 %v2812_v16  ;;  %1452 = vrot.lane.b32.xlu0 %v3026_v25, %s2813_s25  ;;  %s2823_s25 = smov 40  }
 0x270   : > { %1444 = vperm.xlu1 %2689, %v753_v15  }
 0x273   : > { %1104 = vrot.lane.b32.xlu0 %v3026_v25, %s2814_s28  ;;  %s2824_s28 = smov 8  }
 0x274   : > { %1106 = vrot.lane.b32.xlu1 %v3026_v25, %s2815_s26  ;;  %s2825_s26 = smov 16  }
 0x277   : > { %1450 = vrot.lane.b32.xlu0 %v3026_v25, %s2816_s17  ;;  %s2826_s17 = smov 24  }
 0x278   : > { %1798 = vrot.lane.b32.xlu1 %v3026_v25, %s2817_s18 }
 0x27c   : > { %1796 = vrot.lane.b32.xlu1 %v3026_v25, %s2818_s19 }
 0x295   : > { %990 = vxpose.xlu0.b32.start.end [1/1] (short) (narrow) %v3040_v42, 8 }
 0x2ea   : > { %v1099_v17 = vpop.permute.xlu1 %1098  ;;  %v757_v18 = vpop.permute.xlu0 %756 }
 0x2eb   : > { %v759_v19 = vmul.f32 %v757_v18, %v3026_v25  ;;  %v1101_v21 = vmul.f32 %v1099_v17, %v3026_v25 }
 0x2ed   : > { %837 = vrot.lane.b32.xlu1 %v759_v19, %s2819_s20  ;;  %v2154_v19 = vld [vmem:[%s3263_s7 + $0x10] sm:$0xff] }
 0x2ee   : > { %v1453_v20 = vpop.permute.xlu0 %1452 }
 0x2ef   : > { %1682 = vxpose.xlu0.b32.start.end [1/1] (short) (narrow) %v1453_v20, 8  ;;  %v1445_v22 = vpop.permute.xlu1 %1444 }
 0x2f0   : > { %v1447_v23 = vmul.f32 %v1445_v22, %v3026_v25 }
 0x2f1   : > { %1184 = vrot.lane.b32.xlu1 %v1101_v21, %s2820_s21 }
 0x2f2   : > { %v3076_v27 = vpop.permute.xlu0 %1104 }
 0x2f3   : > { %v1107_v26 = vpop.permute.xlu1 %1106 }
 0x2f5   : > { %1530 = vrot.lane.b32.xlu1 %v1447_v23, %s2821_s24  ;;  %s2253_s24 = sshll.u32 %s347_s15, 4  ;;  %s3200_s24 = int_to_ptr.vmem [resolvable:$true] %s2253_s24 }
 0x2f6   : > { %v3080_v29 = vpop.permute.xlu0 %1450 }
 0x2f7   : > { %v3078_v28 = vpop.permute.xlu1 %1798 }
 0x2fb   : > { %v3082_v30 = vpop.permute.xlu1 %1796 }
 0x315   : > { %v1006_v32 = vpop.trf.xlu0 }
 0x318   : > { %2690 = vset.pattern.permute.xlu0 %v2822_v24 }
 0x319   : > { %1790 = vperm.xlu0 %2690, %v753_v15   ;;  %v2153_v15 = vld [vmem:[%s3263_s7 + $0x8] sm:$0xff] }
 0x31a   : > { %v2580_v18 = vpack.c.bf16 %v2153_v15, %v2152_v14 }
 0x31d   : > { %2691 = vset.pattern.permute.xlu0 %v2809_v43 }
 0x31e   : > { %1336 = vxpose.xlu1.b32.start.end [1/1] (short) (narrow) %v1107_v26, 8  ;;  %1331 = vperm.xlu0 %2691, %v3060_v9  }
 0x322   : > { %2692 = vset.pattern.permute.xlu0 %v2822_v24 }
 0x323   : > { %2023 = vperm.xlu0 %2692, %v3060_v9  }
 0x35f   : > { %v838_v31 = vpop.permute.xlu1 %837 }
 0x360   : > { %2476 = vmatpush3.msra.mxu0 %v838_v31  ;;  %2486 = vmatpush3.msra.mxu1 %v838_v31  ;;  %v2371_v31 = vld [vmem:[%s3264_s8] ss:$0 sm:$0xff] }
 0x361   : > { %2478 = vmatmul.mubr.msk.f32.vlgmr.msra.gmra.mrb[6].mxu0 %vm550_vm5, %v835_v33  ;;  %2480 = vmatprep.subr.mxu0 %v2807_v7 }
 0x362   : > { %2488 = vmatmul.mubr.msk.f32.vlgmr.msra.gmra.mrb[4].mxu1 %vm550_vm5, %v1006_v32  ;;  %2490 = vmatprep.subr.mxu1 %v2807_v7 }
 0x363   : > { %2481 = vmatpush3.msra.mxu0 %v760_v34  ;;  %2482 = vmatprep.mubr.msk.f32.mxu0 %vm2806_vm2, %v2807_v7  ;;  %v1185_v35 = vpop.permute.xlu1 %1184 }
 0x364   : > { %2495 = vmatprep.subr.mxu0 %v2807_v7  ;;  %2492 = vmatprep.mubr.msk.f32.mxu1 %vm2806_vm2, %v2807_v7 }
 0x367   : > { %2491 = vmatpush3.xpose.msk.msra.mxu1 %vm550_vm5, %v1107_v26  ;;  %v1531_v40 = vpop.permute.xlu1 %1530 }
 0x368   : > { %2505 = vmatprep.subr.mxu1 %v2807_v7 }
 0x369   : > { %2483 = vmatmul.mubr.msk.f32.vlgmr.msra.gmra.mrb[6].mxu0 %vm550_vm5, %v3026_v25 }
 0x36a   : > { %2496 = vmatpush3.msra.mxu0 %v1185_v35  ;;  %2493 = vmatmul.mubr.msk.f32.vlgmr.msra.gmra.mrb[6].mxu1 %vm550_vm5, %v3076_v27 }
 0x36b   : > { %2506 = vmatpush3.msra.mxu1 %v1185_v35  ;;  %2507 = vmatprep.mubr.msk.f32.mxu1 %vm2806_vm2, %v2807_v7 }
 0x36c   : > { %2510 = vmatprep.subr.mxu1 %v2807_v7  ;;  %2497 = vmatprep.mubr.msk.f32.mxu0 %vm2806_vm2, %v2807_v7 }
 0x36d   : > { %2500 = vmatprep.subr.mxu0 %v2807_v7 }
 0x36f   : > { %v1698_v36 = vpop.trf.xlu0 }
 0x398   : > { %v1791_v37 = vpop.permute.xlu0 %1790 }
 0x399   : > { %v1793_v39 = vmul.f32 %v1791_v37, %v3026_v25 }
 0x39b   : > { %1876 = vrot.lane.b32.xlu1 %v1793_v39, %s2823_s25 }
 0x39d   : > { %v1332_v1 = vpop.permute.xlu0 %1331 }
 0x39e   : > { %v1352_v41 = vpop.trf.xlu1 }
 0x39f   : > { %2508 = vmatmul.mubr.msk.f32.vlgmr.msra.gmra.mrb[8].mxu1 %vm550_vm5, %v1352_v41  ;;  %1677 = vperm.xlu1 %2689, %v3060_v9  }
 0x3a0   : > { %2511 = vmatpush3.xpose.msk.msra.mxu1 %vm550_vm5, %v1453_v20  ;;  %2512 = vmatprep.mubr.msk.f32.mxu1 %vm2806_vm2, %v2807_v7  ;;  %v2155_v20 = vld [vmem:[%s3263_s7 + $0x18] sm:$0xff] }
 0x3a1   : > { %2525 = vmatprep.subr.mxu1 %v2807_v7  ;;  %v2583_v23 = vpack.c.bf16 %v2155_v20, %v2154_v19 }
 0x3a2   : > { %v2024_v10 = vpop.permute.xlu0 %2023 }
 0x3a3   : > { %2513 = vmatmul.mubr.msk.f32.vlgmr.msra.gmra.mrb[10].mxu1 %vm550_vm5, %v3080_v29  ;;  %2693 = vset.pattern.permute.xlu1 %v2810_v44 }
 0x3a4   : > { %2526 = vmatpush3.msra.mxu1 %v1531_v40  ;;  %985 = vperm.xlu1 %2693, %v3060_v9  }
 0x3a5   : > { %2527 = vmatprep.mubr.msk.f32.mxu1 %vm2806_vm2, %v2807_v7  ;;  %2530 = vmatprep.subr.mxu1 %v2807_v7 }
 0x3a7   : > { %2528 = vmatmul.mubr.msk.f32.vlgmr.msra.gmra.mrb[12].mxu1 %vm550_vm5, %v1698_v36 }
 0x3a8   : > { %2532 = vmatprep.mubr.msk.f32.mxu1 %vm2806_vm2, %v2807_v7 }
 0x3ab   : > { %2531 = vmatpush3.xpose.msk.msra.mxu1 %vm550_vm5, %v3078_v28 }
 0x3ac   : > { %2545 = vmatprep.subr.mxu1 %v2807_v7 }
 0x3ae   : > { %2533 = vmatmul.mubr.msk.f32.vlgmr.msra.gmra.mrb[14].mxu1 %vm550_vm5, %v3082_v30 }
 0x3af   : > { %2547 = vmatprep.mubr.msk.f32.mxu1 %vm2806_vm2, %v2807_v7 }
 0x40d   : > { %v1877_v25 = vpop.permute.xlu1 %1876 }
 0x40e   : > { %2546 = vmatpush3.msra.mxu1 %v1877_v25 }
 0x40f   : > { %2579 = vmatprep.subr.bf16.mxu1 %v2805_v4 }
 0x41e   : > { %v1678_v6 = vpop.permute.xlu1 %1677 }
 0x423   : > { %v986_v17 = vpop.permute.xlu1 %985 }
 0x435   : > { %v1091_v42 = vpop.f32.mrb[4].mxu1 }
 0x436   : > { %v1095_v43 = vadd.f32 %v1091_v42, %v760_v34  ;;  %v2489_v44 = vpop.f32.mrb[5].mxu1 }
 0x438   : > { %1096 = vst.msk [vmem:[#allocation2] sm:$0xff] %vm550_vm5, %v1095_v43 }
 0x43c   : > { %v3134_v45 = vpop.f32.mrb[6].mxu0 }
 0x43d   : > { %v2484_v46 = vpop.f32.mrb[7].mxu0  ;;  %v1178_v47 = vpop.f32.mrb[6].mxu1  ;;  %v988_v24 = vmul.f32 %v986_v17, %v3134_v45 }
 0x43e   : > { %v1182_v49 = vsel %vm3029_vm4, %v1178_v47, 0.0  ;;  %v2494_v50 = vpop.f32.mrb[7].mxu1 }
 0x43f   : > { %2498 = vmatmul.mubr.msk.f32.vlgmr.msra.gmra.mrb[8].mxu0 %vm550_vm5, %v1182_v49 }
 0x440   : > { %2501 = vmatpush3.msra.mxu0 %v1103_v48  ;;  %2502 = vmatprep.mubr.msk.f32.mxu0 %vm2806_vm2, %v2807_v7 }
 0x441   : > { %2515 = vmatprep.subr.mxu0 %v2807_v7 }
 0x447   : > { %2503 = vmatmul.mubr.msk.f32.vlgmr.msra.gmra.mrb[8].mxu0 %vm550_vm5, %v3076_v27 }
 0x448   : > { %2516 = vmatpush3.msra.mxu0 %v1531_v40  ;;  %2517 = vmatprep.mubr.msk.f32.mxu0 %vm2806_vm2, %v2807_v7 }
 0x449   : > { %2520 = vmatprep.subr.mxu0 %v2807_v7 }
 0x472   : > { %v1437_v51 = vpop.f32.mrb[8].mxu1 }
 0x473   : > { %v1441_v52 = vadd.f32 %v1437_v51, %v1103_v48  ;;  %v2509_v53 = vpop.f32.mrb[9].mxu1 }
 0x475   : > { %1442 = vst.msk [vmem:[#allocation2 + $0x8] sm:$0xff] %vm550_vm5, %v1441_v52 }
 0x476   : > { %v1524_v54 = vpop.f32.mrb[10].mxu1 }
 0x477   : > { %v1528_v56 = vsel %vm3029_vm4, %v1524_v54, 0.0  ;;  %v2514_v57 = vpop.f32.mrb[11].mxu1 }
 0x478   : > { %2518 = vmatmul.mubr.msk.f32.vlgmr.msra.gmra.mrb[10].mxu0 %vm550_vm5, %v1528_v56 }
 0x479   : > { %2521 = vmatpush3.msra.mxu0 %v1449_v55  ;;  %2522 = vmatprep.mubr.msk.f32.mxu0 %vm2806_vm2, %v2807_v7 }
 0x47a   : > { %v1783_v58 = vpop.f32.mrb[12].mxu1  ;;  %2535 = vmatprep.subr.mxu0 %v2807_v7 }
 0x47b   : > { %v1787_v59 = vadd.f32 %v1783_v58, %v1449_v55  ;;  %v2529_v60 = vpop.f32.mrb[13].mxu1 }
 0x47d   : > { %1788 = vst.msk [vmem:[#allocation2 + $0x10] sm:$0xff] %vm550_vm5, %v1787_v59 }
 0x480   : > { %2523 = vmatmul.mubr.msk.f32.vlgmr.msra.gmra.mrb[10].mxu0 %vm550_vm5, %v3080_v29 }
 0x481   : > { %v1870_v61 = vpop.f32.mrb[14].mxu1  ;;  %2536 = vmatpush3.msra.mxu0 %v1877_v25  ;;  %2537 = vmatprep.mubr.msk.f32.mxu0 %vm2806_vm2, %v2807_v7 }
 0x482   : > { %v2534_v62 = vpop.f32.mrb[15].mxu1  ;;  %2540 = vmatprep.subr.mxu0 %v2807_v7  ;;  %v1874_v0 = vsel %vm3029_vm4, %v1870_v61, 0.0 }
 0x484   : > { %2538 = vmatmul.mubr.msk.f32.vlgmr.msra.gmra.mrb[12].mxu0 %vm550_vm5, %v1874_v0 }
 0x485   : > { %2541 = vmatpush3.msra.mxu0 %v1795_v63  ;;  %2542 = vmatprep.mubr.msk.f32.mxu0 %vm2806_vm2, %v2807_v7 }
 0x48c   : > { %2543 = vmatmul.mubr.msk.f32.vlgmr.msra.gmra.mrb[12].mxu0 %vm550_vm5, %v3082_v30 }
 0x51a   : > { %v1326_v2 = vpop.f32.mrb[8].mxu0 }
 0x51b   : > { %v1334_v3 = vmul.f32 %v1332_v1, %v1326_v2  ;;  %v2504_v5 = vpop.f32.mrb[9].mxu0 }
 0x51d   : > { %2136 = vrot.lane.b32.xlu1 %v1334_v3, %s2824_s28 }
 0x553   : > { %v1672_v8 = vpop.f32.mrb[10].mxu0 }
 0x554   : > { %v1680_v9 = vmul.f32 %v1678_v6, %v1672_v8  ;;  %v2524_v38 = vpop.f32.mrb[11].mxu0 }
 0x556   : > { %2140 = vrot.lane.b32.xlu0 %v1680_v9, %s2825_s26 }
 0x55f   : > { %v2018_v11 = vpop.f32.mrb[12].mxu0 }
 0x560   : > { %v2026_v12 = vmul.f32 %v2024_v10, %v2018_v11  ;;  %v2544_v13 = vpop.f32.mrb[13].mxu0 }
 0x562   : > { %2144 = vrot.lane.b32.xlu1 %v2026_v12, %s2826_s17  ;;  %s2374_s17 = sshll.u32 %s2790_s13, 1 }
 0x563   : > { %s2249_s18 = sadd.s32 %s2786_s12, %s2374_s17  ;;  %s3277_s12 = sand.u32 1, %s2778_s10  }
 0x564   : > { %s2375_s21 = sshll.u32 %s2249_s18, 7  ;;  %s2238_s26 = scalar_lea.sflag [#allocation5], %s3277_s12 }
 0x565   : > { %s3198_s13 = scalar_lea.hbm %s3265_s9, %s2375_s21  ;;  %s2708_s17 = scalar_lea.vmem %s3200_s24, 128 }
 0x566   : > { %p2709_p1 = scmp.ne.s32.totalorder %s3200_s24, %s2708_s17  ;;  %s2827_s18 = smov [#allocation4]  }
 0x567   : > { %s2712_s19 = sshll.u32 %s2827_s18, 4  ;;  %s2713_s19 = int_to_ptr.vmem [resolvable:$false] %s2712_s19 }
 0x568   : > { %p2710_p2 = pnand %p2709_p1, %p2929_p3  ;;  %s2714_s20 = scalar_lea.vmem %s2713_s19, 256 }
 0x569   : > { %p2715_p5 = scmp.lt.s32.totalorder %s3200_s24, %s2713_s19  ;;  %p2716_p6 = scmp.lt.s32.totalorder %s2714_s20, %s2708_s17 }
 0x56a   : > { %p2711_p4 = pneg %p2710_p2 }
 0x56b   : > { %p2717_p7 = por %p2716_p6, %p2715_p5 }
 0x56d   : > { %p2718_p9 = pnand %p2717_p7, %p2711_p4 }
 0x574   : > { %2028 = vxpose.xlu0.b32.start.end [1/1] (short) (narrow) %v3078_v28, 8 }
 0x58f   : > { %v2137_v22 = vpop.permute.xlu1 %2136 }
 0x590   : > { %v2147_v27 = vsel %vm550_vm5, %v988_v24, %v2137_v22 }
 0x5c8   : > { %v2141_v16 = vpop.permute.xlu0 %2140 }
 0x5c9   : > { %v2149_v28 = vsel %vm2148_vm7, %v2147_v27, %v2141_v16 }
 0x5d4   : > { %v2145_v26 = vpop.permute.xlu1 %2144 }
 0x5d5   : > { %v2151_v29 = vsel %vm2150_vm8, %v2149_v28, %v2145_v26 }
 0x5f4   : > { %v2044_v21 = vpop.trf.xlu0 }
 0x5f5   : > { %2548 = vmatmul.mubr.msk.f32.vlgmr.msra.gmra.mrb[16].mxu1 %vm550_vm5, %v2044_v21 }
 0x5f6   : > { %2581 = vmatpush3.bf16.msra.mxu1 %v2580_v18  ;;  %2558 = vmatprep.mubr.msk.f32.mxu1 %vm2806_vm2, %v2807_v7 }
 0x5f7   : > { %2582 = vmatprep.subr.bf16.mxu1 %v2805_v4 }
 0x5fa   : > { %2584 = vmatpush3.bf16.msra.mxu1 %v2583_v23 }
 0x5fd   : > { %2559 = vmatmul.mubr.msk.f32.vlgmr.msra.gmra.mrb[18].mxu1 %vm379_vm3, %v2151_v29 }
 0x6c8   : > { %v2129_v30 = vpop.f32.mrb[16].mxu1 }
 0x6c9   : > { %v2133_v7 = vadd.f32 %v2129_v30, %v1795_v63  ;;  %v2549_v4 = vpop.f32.mrb[17].mxu1 }
 0x6cb   : > { %2134 = vst.msk [vmem:[#allocation2 + $0x18] sm:$0xff] %vm550_vm5, %v2133_v7 }
 0x6d0   : > { %v2232_v32 = vpop.f32.mrb[18].mxu1 }
 0x6d1   : > { %v2233_v33 = vadd.f32 %v2371_v31, %v2232_v32  ;;  %v2560_v34 = vpop.f32.mrb[19].mxu1 }
 0x6d3   : > { %2236 = vst.msk [vmem:[%s347_s15] sm:$0xff] %vm379_vm3, %v2233_v33 }
 0x6d4   : > { %2721 = shalt.err (!%p2718_p9)
}
 0x6d5   : > { %s2722_s15 = scalar_lea.hbm %s3198_s13, 128  ;;  %s2726_s25 = scalar_lea.hbm %s3265_s9, 512 }
 0x6d6   : > { %p2723_p10 = scmp.ne.s32.totalorder %s3198_s13, %s2722_s15  ;;  %p2727_p13 = scmp.lt.u32.totalorder %s3198_s13, %s3265_s9 }
 0x6d7   : > { %p2728_p0 = scmp.lt.u32.totalorder %s2726_s25, %s2722_s15  ;;  %p2730_p2 = scmp.lt.u32.totalorder %s2722_s15, %s3198_s13 }
 0x6d8   : > { %p2724_p11 = pnand %p2723_p10, %p2929_p3 }
 0x6d9   : > { %p2729_p1 = por %p2728_p0, %p2727_p13 }
 0x6da   : > { %p2725_p12 = pneg %p2724_p11 }
 0x6db   : > { %p2731_p4 = por %p2730_p2, %p2729_p1 }
 0x6dd   : > { %p2732_p5 = pnand %p2731_p4, %p2725_p12 }
 0x6df   : > { %2735 = shalt.err (!%p2732_p5)
}
 0x6e0   : > { %2593 = dma.vmem_to_hbm [thread:$0]  (%p2929_p3), %s3200_s24, 128, %s3198_s13, %s2238_s26  }
 0x6e1 PF: > { %p2599_p6 = scmp.ge.s32.totalorder %s2802_s16, 2  ;;  %s2265_s17 = sand.u32 1, %s2774_s30  }
 0x6e2   : > { %s2266_s18 = scalar_lea.sflag [#allocation5], %s2265_s17 }
 0x6e3   : > { %p2596_p7 = pnand %p2599_p6, %p2938_p8 }
 0x6e5   : > { %2769 = dma.done.wait (!%p2596_p7), %s2266_s18, 128  }
 0x6e6   : > { %2771 = vsyncadd (!%p2596_p7), %s2266_s18, 4294967168  ;;  %s22_s16 = sadd.s32 1, %s2802_s16   ;;  %s3278_s13 = sld [smem:[#allocation7_spill]] }
 0x6e7   : > { %p19_p9 = scmp.ge.s32.totalorder %s22_s16, 6   ;;  %s3279_s22 = sld [smem:[#allocation8_spill]] }
 0x6e8   : > { %s3280_s15 = sld [smem:[#allocation9_spill]]  ;;  %s3281_s30 = smov %s2778_s10 }
 0x6e9   : > { %s3282_s10 = smov %s2782_s11  ;;  %s3283_s11 = smov %s2947_s27 }
 0x6ea   : > { %s3284_s12 = smov %s2794_s14  ;;  %21 = sbr.rel (!%p19_p9) target bundleno = 5 (0x5), region = 98 }
 0x6ed   : > { %s3285_s14 = smov %s3279_s22 }
 0x6f1   :  { %2271 = vsyncpa [#allocation5], 1 }
 0x6f2   :  { %2273 = vsyncpa [#allocation5 + $0x1], 1 }

</bundles_post_ra>
